<compile_context>
chip_gen: v5e
topology: v5e:2x2
jax: 0.10.0
libtpu: 0.0.40
codegen_flags: <defaults>
</compile_context>

<pallas_src>
import math
import functools

import jax
import jax.numpy as jnp
from jax.experimental import pallas as pl
from jax.experimental.pallas import tpu as pltpu

LOG2 = math.log(2.0)
LANE = 128


def _round_up(x, m):
    return ((x + m - 1) // m) * m


@functools.lru_cache(maxsize=1)
def _tpu_limits():
    """Returns (per-core VMEM bytes, #TensorCores per chip) with safe fallbacks."""
    vmem = 128 * 1024 * 1024
    try:
        info = pltpu.get_tpu_info()
        vmem = int(getattr(info, "vmem_capacity_bytes", vmem))
    except Exception:  # no TPU info available at trace time -> conservative defaults
        pass
    # v7x: 64 MiB per TensorCore, 2 TCs/chip; v5e/v6e: 128 MiB, 1 TC/chip.
    cores = 2 if vmem <= 64 * 1024 * 1024 else 1
    return vmem, cores


def _weight_spec(shape):
    """Grid-invariant block: single-buffer it when this jax version supports Buffered."""
    try:
        return pl.BlockSpec(shape, lambda i: (0, 0), pipeline_mode=pl.Buffered(1))
    except TypeError:
        return pl.BlockSpec(shape, lambda i: (0, 0))


def _mlp_kernel(x_ref, w1t_ref, w2t_ref, b2_ref, w3_ref, o_ref):
    # fc1 (no bias, use_z2=True): bf16 MXU operands, f32 accumulation.
    x = x_ref[...].astype(jnp.bfloat16)
    h1 = jnp.dot(x, w1t_ref[...], preferred_element_type=jnp.float32)
    # activation1 = lncosh(x) = -x + softplus(2x) - log(2)  (f32 VPU/EUP math)
    a1 = -h1 + jax.nn.softplus(2.0 * h1) - LOG2

    # fc2 (with bias)
    h2 = jnp.dot(a1.astype(jnp.bfloat16), w2t_ref[...],
                 preferred_element_type=jnp.float32) + b2_ref[...]
    a2 = jax.nn.softplus(h2)

    # fc3 (hidden -> 1, no bias) followed by sum(dim=1): width-1 matmul replaced by a VPU
    # broadcast-multiply + lane reduction; stored lane-dense as a (1, tile_b) block.
    row = jnp.sum(a2 * w3_ref[...], axis=-1)          # (tile_b,)
    o_ref[...] = row[None, :]                         # (1, tile_b)


def prepare_params(w1, b2, w2, w3):
    """One-time weight prep (call OUTSIDE the per-step forward): pre-transpose and cast the
    MXU operands to bf16; keep bias / readout vector in f32."""
    hidden = w1.shape[0]
    return (
        jnp.asarray(w1, jnp.float32).T.astype(jnp.bfloat16),      # (dim, hidden)
        jnp.asarray(w2, jnp.float32).T.astype(jnp.bfloat16),      # (hidden, hidden)
        jnp.asarray(b2, jnp.float32).reshape(1, hidden),          # (1, hidden)
        jnp.asarray(w3, jnp.float32).reshape(1, hidden),          # (1, hidden)
    )


@functools.partial(jax.jit, static_argnames=("max_tile_rows",))
def mlp_forward(x, w1t, w2t, b2r, w3r, *, max_tile_rows=2048):
    """x: (B, dim); w1t: (dim, hidden) bf16; w2t: (hidden, hidden) bf16; b2r/w3r: (1, hidden) f32.

    Returns (B,) == out.sum(dim=1) of the PyTorch forward.
    """
    B, dim = x.shape
    hidden = w1t.shape[1]
    vmem_cap, num_cores = _tpu_limits()

    # ---- Batch tile from the real per-core VMEM budget ------------------------------
    # Per batch row (bytes): double-buffered f32 x tile + output lane + ~6 f32 activation
    # temps + one bf16 copy of a1 fed to the MXU.
    per_row = 2 * dim * 4 + 2 * 4 + 6 * hidden * 4 + hidden * 2
    # Resident weights: single-buffered bf16 matrices + f32 b2/w3.
    weight_bytes = (dim * hidden + hidden * hidden) * 2 + 2 * hidden * 4
    budget = int(0.6 * vmem_cap) - weight_bytes
    rows = max(LANE, (max(budget, 0) // max(per_row, 1)) // LANE * LANE)
    rows = min(rows, max(LANE, (max_tile_rows // LANE) * LANE))
    rows = min(rows, _round_up(B, LANE))
    if num_cores >= 2 and B >= 2 * LANE:
        # Only split to feed both TensorCores on megacore chips (v7x).
        rows = min(rows, _round_up(pl.cdiv(B, num_cores), LANE))
    eff_tile = max(LANE, rows)

    B_pad = _round_up(B, eff_tile)
    if B_pad != B:
        x = jnp.pad(x, ((0, B_pad - B), (0, 0)))
    num_tiles = B_pad // eff_tile

    # ---- VMEM limit (per core) and cost hint ----------------------------------------
    vmem_est = (
        weight_bytes
        + 2 * eff_tile * dim * 4        # double-buffered f32 x tile
        + 2 * eff_tile * 4              # double-buffered (1, tile) output block
        + 6 * eff_tile * hidden * 4     # f32 activation temps
        + eff_tile * hidden * 2         # bf16 a1 copy
    )
    headroom = 16 * 1024 * 1024
    vmem_limit = int(min(max(vmem_cap - headroom, 16 * 1024 * 1024),
                         max(vmem_est, 32 * 1024 * 1024)))

    cost = pl.CostEstimate(
        flops=2 * B_pad * (dim * hidden + hidden * hidden + hidden),
        transcendentals=4 * B_pad * hidden,  # two softplus ~= (exp + log1p) each
        bytes_accessed=(4 * B_pad * dim
                        + 2 * (dim * hidden + hidden * hidden)
                        + 4 * 2 * hidden
                        + 4 * B_pad),
    )

    out = pl.pallas_call(
        _mlp_kernel,
        out_shape=jax.ShapeDtypeStruct((1, B_pad), jnp.float32),
        grid_spec=pltpu.PrefetchScalarGridSpec(
            num_scalar_prefetch=0,
            grid=(num_tiles,),
            in_specs=[
                pl.BlockSpec((eff_tile, dim), lambda i: (i, 0)),
                _weight_spec((dim, hidden)),
                _weight_spec((hidden, hidden)),
                _weight_spec((1, hidden)),
                _weight_spec((1, hidden)),
            ],
            out_specs=pl.BlockSpec((1, eff_tile), lambda i: (0, i)),
        ),
        compiler_params=pltpu.CompilerParams(
            dimension_semantics=("parallel",),
            vmem_limit_bytes=vmem_limit,
        ),
        cost_estimate=cost,
    )(x, w1t, w2t, b2r, w3r)

    return out.reshape(B_pad)[:B]


def _reference(x, w1, b2, w2, w3):
    h1 = x @ w1.T
    a1 = -h1 + jax.nn.softplus(2.0 * h1) - LOG2
    h2 = a1 @ w2.T + b2
    a2 = jax.nn.softplus(h2)
    return (a2 @ w3.T).sum(axis=1)


if __name__ == "__main__":
    B, dim, hidden = 8, 16, 32

    key = jax.random.PRNGKey(0)
    kx, k1, k2, kb2, k3 = jax.random.split(key, 5)

    # Deterministic PyTorch-style uniform(-1/sqrt(fan_in), 1/sqrt(fan_in)) init.
    x = jax.random.normal(kx, (B, dim), dtype=jnp.float32)
    w1 = jax.random.uniform(k1, (hidden, dim), jnp.float32,
                            -1.0 / math.sqrt(dim), 1.0 / math.sqrt(dim))
    w2 = jax.random.uniform(k2, (hidden, hidden), jnp.float32,
                            -1.0 / math.sqrt(hidden), 1.0 / math.sqrt(hidden))
    b2 = jax.random.uniform(kb2, (hidden,), jnp.float32,
                            -1.0 / math.sqrt(hidden), 1.0 / math.sqrt(hidden))
    w3 = jax.random.uniform(k3, (1, hidden), jnp.float32,
                            -1.0 / math.sqrt(hidden), 1.0 / math.sqrt(hidden))

    # One-time weight preparation (pre-transposed, bf16) outside the jitted forward.
    w1t, w2t, b2r, w3r = prepare_params(w1, b2, w2, w3)

    y = jax.block_until_ready(mlp_forward(x, w1t, w2t, b2r, w3r))

    y_ref = _reference(x, w1, b2, w2, w3)
    assert y.shape == (B,)
    # bf16 MXU operands -> compare against the f32 reference with a looser tolerance.
    assert jnp.allclose(y, y_ref, atol=2e-2, rtol=2e-2), (y, y_ref)

    print("KERNEL_OK")
</pallas_src>

<mosaic_0001>
module attributes {stable_mosaic.version = 11 : i64} {
  func.func @_mlp_kernel(%arg0: i32, %arg1: memref<128x16xf32, #tpu.memory_space<vmem>>, %arg2: memref<16x32xbf16, #tpu.memory_space<vmem>>, %arg3: memref<32x32xbf16, #tpu.memory_space<vmem>>, %arg4: memref<1x32xf32, #tpu.memory_space<vmem>>, %arg5: memref<1x32xf32, #tpu.memory_space<vmem>>, %arg6: memref<1x128xf32, #tpu.memory_space<vmem>>) attributes {dimension_semantics = [#tpu.dimension_semantics<parallel>], iteration_bounds = array<i64: 1>, scalar_prefetch = 0 : i64, scratch_operands = 0 : i64, tpu.core_type = #tpu.core_type<tc>, window_params = [{transform_indices = @transform_0, window_bounds = array<i64: 128, 16>}, {pipeline_mode = #tpu.pipeline_mode<synchronous>, transform_indices = @transform_1, window_bounds = array<i64: 16, 32>}, {pipeline_mode = #tpu.pipeline_mode<synchronous>, transform_indices = @transform_2, window_bounds = array<i64: 32, 32>}, {pipeline_mode = #tpu.pipeline_mode<synchronous>, transform_indices = @transform_3, window_bounds = array<i64: 1, 32>}, {pipeline_mode = #tpu.pipeline_mode<synchronous>, transform_indices = @transform_4, window_bounds = array<i64: 1, 32>}, {transform_indices = @transform_5, window_bounds = array<i64: 1, 128>}]} {
    %c0 = arith.constant 0 : index
    %c0_0 = arith.constant 0 : index
    %0 = vector.load %arg1[%c0, %c0_0] : memref<128x16xf32, #tpu.memory_space<vmem>>, vector<128x16xf32>
    %1 = arith.truncf %0 : vector<128x16xf32> to vector<128x16xbf16>
    %c0_1 = arith.constant 0 : index
    %c0_2 = arith.constant 0 : index
    %2 = vector.load %arg2[%c0_1, %c0_2] : memref<16x32xbf16, #tpu.memory_space<vmem>>, vector<16x32xbf16>
    %cst = arith.constant dense<0.000000e+00> : vector<128x32xf32>
    %3 = tpu.matmul %1, %2, %cst {dimension_numbers = #tpu.dot_dimension_numbers<[1], [0], [0], [1], [0, 0, 1, 1], [], []>} : vector<128x16xbf16>, vector<16x32xbf16>, vector<128x32xf32> -> vector<128x32xf32>
    %cst_3 = arith.constant 0.000000e+00 : f32
    %4 = vector.broadcast %cst_3 : f32 to vector<128x32xf32>
    %5 = arith.subf %4, %3 : vector<128x32xf32>
    %cst_4 = arith.constant 2.000000e+00 : f32
    %6 = vector.broadcast %cst_4 : f32 to vector<128x32xf32>
    %7 = arith.mulf %6, %3 : vector<128x32xf32>
    %cst_5 = arith.constant 0.000000e+00 : f32
    %8 = vector.broadcast %cst_5 : f32 to vector<128x32xf32>
    %9 = arith.maximumf %7, %8 : vector<128x32xf32>
    %10 = vector.broadcast %cst_5 : f32 to vector<128x32xf32>
    %11 = arith.subf %7, %10 : vector<128x32xf32>
    %12 = arith.cmpf one, %11, %11 : vector<128x32xf32>
    %13 = vector.broadcast %cst_5 : f32 to vector<128x32xf32>
    %14 = arith.addf %7, %13 : vector<128x32xf32>
    %15 = math.absf %11 : vector<128x32xf32>
    %cst_6 = arith.constant 0.000000e+00 : f32
    %16 = vector.broadcast %cst_6 : f32 to vector<128x32xf32>
    %17 = arith.subf %16, %15 : vector<128x32xf32>
    %18 = math.exp %17 : vector<128x32xf32>
    %19 = math.log1p %18 : vector<128x32xf32>
    %20 = arith.addf %9, %19 : vector<128x32xf32>
    %21 = arith.select %12, %14, %20 : vector<128x32xi1>, vector<128x32xf32>
    %22 = arith.addf %5, %21 : vector<128x32xf32>
    %cst_7 = arith.constant 0.693147182 : f32
    %23 = vector.broadcast %cst_7 : f32 to vector<128x32xf32>
    %24 = arith.subf %22, %23 : vector<128x32xf32>
    %25 = arith.truncf %24 : vector<128x32xf32> to vector<128x32xbf16>
    %c0_8 = arith.constant 0 : index
    %c0_9 = arith.constant 0 : index
    %26 = vector.load %arg3[%c0_8, %c0_9] : memref<32x32xbf16, #tpu.memory_space<vmem>>, vector<32x32xbf16>
    %cst_10 = arith.constant dense<0.000000e+00> : vector<128x32xf32>
    %27 = tpu.matmul %25, %26, %cst_10 {dimension_numbers = #tpu.dot_dimension_numbers<[1], [0], [0], [1], [0, 0, 1, 1], [], []>} : vector<128x32xbf16>, vector<32x32xbf16>, vector<128x32xf32> -> vector<128x32xf32>
    %c0_11 = arith.constant 0 : index
    %c0_12 = arith.constant 0 : index
    %28 = vector.load %arg4[%c0_11, %c0_12] : memref<1x32xf32, #tpu.memory_space<vmem>>, vector<1x32xf32>
    %29 = vector.broadcast %28 : vector<1x32xf32> to vector<128x32xf32>
    %30 = arith.addf %27, %29 : vector<128x32xf32>
    %cst_13 = arith.constant 0.000000e+00 : f32
    %31 = vector.broadcast %cst_13 : f32 to vector<128x32xf32>
    %32 = arith.maximumf %30, %31 : vector<128x32xf32>
    %33 = vector.broadcast %cst_13 : f32 to vector<128x32xf32>
    %34 = arith.subf %30, %33 : vector<128x32xf32>
    %35 = arith.cmpf one, %34, %34 : vector<128x32xf32>
    %36 = vector.broadcast %cst_13 : f32 to vector<128x32xf32>
    %37 = arith.addf %30, %36 : vector<128x32xf32>
    %38 = math.absf %34 : vector<128x32xf32>
    %cst_14 = arith.constant 0.000000e+00 : f32
    %39 = vector.broadcast %cst_14 : f32 to vector<128x32xf32>
    %40 = arith.subf %39, %38 : vector<128x32xf32>
    %41 = math.exp %40 : vector<128x32xf32>
    %42 = math.log1p %41 : vector<128x32xf32>
    %43 = arith.addf %32, %42 : vector<128x32xf32>
    %44 = arith.select %35, %37, %43 : vector<128x32xi1>, vector<128x32xf32>
    %c0_15 = arith.constant 0 : index
    %c0_16 = arith.constant 0 : index
    %45 = vector.load %arg5[%c0_15, %c0_16] : memref<1x32xf32, #tpu.memory_space<vmem>>, vector<1x32xf32>
    %46 = vector.broadcast %45 : vector<1x32xf32> to vector<128x32xf32>
    %47 = arith.mulf %44, %46 : vector<128x32xf32>
    %cst_17 = arith.constant dense<0.000000e+00> : vector<128xf32>
    %48 = vector.multi_reduction <add>, %47, %cst_17 [1] : vector<128x32xf32> to vector<128xf32>
    %49 = vector.shape_cast %48 : vector<128xf32> to vector<1x128xf32>
    %c0_18 = arith.constant 0 : index
    %c0_19 = arith.constant 0 : index
    %50 = vector.load %arg6[%c0_18, %c0_19] : memref<1x128xf32, #tpu.memory_space<vmem>>, vector<1x128xf32>
    tpu.vector_store %arg6[%c0_18, %c0_19], %49 {strides = array<i32>} : memref<1x128xf32, #tpu.memory_space<vmem>>, vector<1x128xf32>,
    return
  }
  func.func @transform_0(%arg0: i32) -> (i32, i32) {
    %c0_i32 = arith.constant 0 : i32
    %c0_i32_0 = arith.constant 0 : i32
    return %arg0, %c0_i32 : i32, i32
  }
  func.func @transform_1(%arg0: i32) -> (i32, i32) {
    %c0_i32 = arith.constant 0 : i32
    %c0_i32_0 = arith.constant 0 : i32
    %c0_i32_1 = arith.constant 0 : i32
    return %c0_i32, %c0_i32_0 : i32, i32
  }
  func.func @transform_2(%arg0: i32) -> (i32, i32) {
    %c0_i32 = arith.constant 0 : i32
    %c0_i32_0 = arith.constant 0 : i32
    %c0_i32_1 = arith.constant 0 : i32
    return %c0_i32, %c0_i32_0 : i32, i32
  }
  func.func @transform_3(%arg0: i32) -> (i32, i32) {
    %c0_i32 = arith.constant 0 : i32
    %c0_i32_0 = arith.constant 0 : i32
    %c0_i32_1 = arith.constant 0 : i32
    return %c0_i32, %c0_i32_0 : i32, i32
  }
  func.func @transform_4(%arg0: i32) -> (i32, i32) {
    %c0_i32 = arith.constant 0 : i32
    %c0_i32_0 = arith.constant 0 : i32
    %c0_i32_1 = arith.constant 0 : i32
    return %c0_i32, %c0_i32_0 : i32, i32
  }
  func.func @transform_5(%arg0: i32) -> (i32, i32) {
    %c0_i32 = arith.constant 0 : i32
    %c0_i32_0 = arith.constant 0 : i32
    return %c0_i32, %arg0 : i32, i32
  }
}

</mosaic_0001>

<bundles_post_ra>
// kernel: mlp_forward.1
= control target key start
LH: loop header
LB: loop body
LE: loop exit
PB: predicated region body
PF: predicated region fallthrough
CT: control target
= control target key end

     0   :  { %vm53_vm0 = vcmask 130048   ;;  %vm507_vm5 = vcmask 261120   ;;  %s1663_s1 = inlined_call_operand.vmem [shape: bf16[16,32], index: 1, kind: input, shape index: {}]   ;;  %s1664_s0 = inlined_call_operand.vmem [shape: f32[128,16], index: 0, kind: input, shape index: {}]   ;;  %s1665_s2 = inlined_call_operand.vmem [shape: bf16[32,32], index: 2, kind: input, shape index: {}]   ;;  %s1666_s3 = inlined_call_operand.vmem [shape: f32[1,32], index: 3, kind: input, shape index: {}]   ;;  %s1667_s4 = inlined_call_operand.vmem [shape: f32[1,32], index: 4, kind: input, shape index: {}]   ;;  %s1668_s5 = inlined_call_operand.vmem [shape: f32[1,128], index: 5, kind: output, shape index: {}]  }
   0x1   :  { %v1066_v0 = vld [vmem:[%s1663_s1] sm:$0xff]  ;;  %v22_v2 = vld [vmem:[%s1664_s0 + $0x8] sm:$0xff]  ;;  %v31_v4 = vld [vmem:[%s1664_s0 + $0x50] sm:$0xff] }
   0x2   :  { %v21_v1 = vld [vmem:[%s1664_s0] sm:$0xff]  ;;  %85 = vmatpush.bf16.msra.mxu0 %v1066_v0  ;;  %1069 = vmatpush.bf16.msra.mxu3 %v1066_v0  ;;  %v32_v5 = vld [vmem:[%s1664_s0 + $0x58] sm:$0xff]  ;;  %v23_v7 = vld [vmem:[%s1664_s0 + $0x10] sm:$0xff] }
   0x3   :  { %v37_v3 = vpack.c.bf16 %v22_v2, %v21_v1  ;;  %v42_v6 = vpack.c.bf16 %v32_v5, %v31_v4  ;;  %v24_v8 = vld [vmem:[%s1664_s0 + $0x18] sm:$0xff]  ;;  %v33_v10 = vld [vmem:[%s1664_s0 + $0x60] sm:$0xff]  ;;  %v34_v11 = vld [vmem:[%s1664_s0 + $0x68] sm:$0xff] }
   0x4   :  { %v38_v9 = vpack.c.bf16 %v24_v8, %v23_v7  ;;  %v43_v12 = vpack.c.bf16 %v34_v11, %v33_v10  ;;  %v25_v13 = vld [vmem:[%s1664_s0 + $0x20] sm:$0xff]  ;;  %v26_v14 = vld [vmem:[%s1664_s0 + $0x28] sm:$0xff]  ;;  %v35_v16 = vld [vmem:[%s1664_s0 + $0x70] sm:$0xff] }
   0x5   :  { %1026 = vmatmul.msk.bf16.vlgmr.msra.gmra.mxu0 %vm53_vm0, %v37_v3  ;;  %1031 = vmatmul.msk.bf16.vlgmr.msra.gmra.mxu3 %vm53_vm0, %v42_v6  ;;  %v39_v15 = vpack.c.bf16 %v26_v14, %v25_v13  ;;  %v36_v17 = vld [vmem:[%s1664_s0 + $0x78] sm:$0xff]  ;;  %v27_v19 = vld [vmem:[%s1664_s0 + $0x30] sm:$0xff]  ;;  %v29_v22 = vld [vmem:[%s1664_s0 + $0x40] sm:$0xff] }
   0x6   :  { %v44_v18 = vpack.c.bf16 %v36_v17, %v35_v16  ;;  %v28_v20 = vld [vmem:[%s1664_s0 + $0x38] sm:$0xff]  ;;  %v30_v23 = vld [vmem:[%s1664_s0 + $0x48] sm:$0xff]  ;;  %v1067_v33 = vld [vmem:[%s1665_s2] sm:$0xff] }
   0x7   :  { %v40_v21 = vpack.c.bf16 %v28_v20, %v27_v19  ;;  %v41_v24 = vpack.c.bf16 %v30_v23, %v29_v22  ;;  %v1068_v29 = vld [vmem:[%s1665_s2 + $0x8] sm:$0xff] }
   0x8   :  { %538 = vmatpush.bf16.msra.mxu1 %v1068_v29  ;;  %1070 = vmatpush.bf16.msra.mxu2 %v1068_v29 }
   0xc   :  { %539 = vmatpush.bf16.msra.mxu1 %v1067_v33  ;;  %1071 = vmatpush.bf16.msra.mxu2 %v1067_v33 }
  0x15   :  { %1027 = vmatmul.msk.bf16.gmra.mxu0 %vm53_vm0, %v38_v9  ;;  %1032 = vmatmul.msk.bf16.gmra.mxu3 %vm53_vm0, %v43_v12 }
  0x25   :  { %1028 = vmatmul.msk.bf16.gmra.mxu0 %vm53_vm0, %v39_v15  ;;  %1033 = vmatmul.msk.bf16.gmra.mxu3 %vm53_vm0, %v44_v18 }
  0x35   :  { %1029 = vmatmul.msk.bf16.gmra.mxu0 %vm53_vm0, %v40_v21 }
  0x45   :  { %1030 = vmatmul.msk.bf16.gmra.mxu0 %vm53_vm0, %v41_v24 }
  0x82   :  { %v1291_v25 = vpop.f32.mrf.mxu0 }
  0x83   :  { %v1294_v26 = vmul.f32 2.0, %v1291_v25  ;;  %v127_v13 = vsub.f32 0.0, %v1291_v25 }
  0x85   :  { %v207_v27 = vand.u32 2147483647, %v1294_v26  ;;  %v159_v61 = vmax.f32 %v1294_v26, 0.0  ;;  %vm175_vm3 = vcmp.ne.f32.partialorder %v1294_v26, %v1294_v26 }
  0x87   :  { %v223_v28 = vsub.f32 0.0, %v207_v27 }
  0x88   :  { %v1336_v33 = vpop.f32.mrf.mxu3 }
  0x89   :  { %v239_v30 = vmul.f32 1.442695, %v223_v28 }
  0x8a   :  { %v1300_v31 = vpop.f32.mrf.mxu0 }
  0x8b   :  { %1074 = vpow2.f32 %v239_v30  ;;  %v144_v32 = vmul.f32 2.0, %v1300_v31  ;;  %v128_v8 = vsub.f32 0.0, %v1300_v31 }
  0x8d   :  { %v208_v34 = vand.u32 2147483647, %v144_v32  ;;  %v160_v5 = vmax.f32 %v144_v32, 0.0  ;;  %vm176_vm4 = vcmp.ne.f32.partialorder %v144_v32, %v144_v32 }
  0x8f   :  { %v224_v35 = vsub.f32 0.0, %v208_v34 }
  0x91   :  { %v1075_v36 = vpop.eup %1074  ;;  %v241_v37 = vmul.f32 1.442695, %v224_v35 }
  0x92   :  { %v271_v38 = vadd.f32 1.0, %v1075_v36  ;;  %v1306_v39 = vpop.f32.mrf.mxu0  ;;  %v274_v42 = vmul.f32 -0.5, %v1075_v36  ;;  %v277_v50 = vand.u32 2147483647, %v1075_v36 }
  0x93   :  { %1076 = vpow2.f32 %v241_v37  ;;  %v1309_v40 = vmul.f32 2.0, %v1306_v39 }
  0x94   :  { %1078 = vlog2.f32 %v271_v38  ;;  %v275_v47 = vadd.f32 1.0, %v274_v42  ;;  %vm278_vm1 = vcmp.lt.f32.partialorder %v277_v50, 0.0004427343 }
  0x95   :  { %v209_v41 = vand.u32 2147483647, %v1309_v40  ;;  %vm177_vm8 = vcmp.ne.f32.partialorder %v1309_v40, %v1309_v40 }
  0x96   :  { %v276_v55 = vmul.f32 %v1075_v36, %v275_v47 }
  0x97   :  { %v225_v43 = vsub.f32 0.0, %v209_v41  ;;  %v161_v41 = vmax.f32 %v1309_v40, 0.0 }
  0x99   :  { %v1077_v44 = vpop.eup %1076  ;;  %v243_v45 = vmul.f32 1.442695, %v225_v43 }
  0x9a   :  { %v1079_v46 = vpop.eup %1078  ;;  %v280_v48 = vadd.f32 1.0, %v1077_v44  ;;  %v1312_v49 = vpop.f32.mrf.mxu0  ;;  %v283_v51 = vmul.f32 -0.5, %v1077_v44  ;;  %v286_v59 = vand.u32 2147483647, %v1077_v44 }
  0x9b   :  { %1080 = vpow2.f32 %v243_v45  ;;  %v1315_v52 = vmul.f32 2.0, %v1312_v49  ;;  %v273_v53 = vmul.f32 0.6931472, %v1079_v46 }
  0x9c   :  { %1082 = vlog2.f32 %v280_v48  ;;  %v284_v56 = vadd.f32 1.0, %v283_v51  ;;  %vm287_vm2 = vcmp.lt.f32.partialorder %v286_v59, 0.0004427343  ;;  %v129_v59 = vsub.f32 0.0, %v1306_v39 }
  0x9d   :  { %v210_v54 = vand.u32 2147483647, %v1315_v52  ;;  %v279_v58 = vsel %vm278_vm1, %v276_v55, %v273_v53  ;;  %v162_v48 = vmax.f32 %v1315_v52, 0.0  ;;  %v130_v55 = vsub.f32 0.0, %v1312_v49 }
  0x9e   :  { %v415_v2 = vadd.f32 %v279_v58, %v159_v61  ;;  %v285_v4 = vmul.f32 %v1077_v44, %v284_v56  ;;  %vm178_vm9 = vcmp.ne.f32.partialorder %v1315_v52, %v1315_v52 }
  0x9f   :  { %v226_v57 = vsub.f32 0.0, %v210_v54 }
  0xa0   :  { %v431_v10 = vsel %vm175_vm3, %v1294_v26, %v415_v2 }
  0xa1   :  { %v1081_v60 = vpop.eup %1080  ;;  %v245_v62 = vmul.f32 1.442695, %v226_v57  ;;  %v447_v19 = vadd.f32 %v431_v10, %v127_v13 }
  0xa2   :  { %v1083_v63 = vpop.eup %1082  ;;  %v289_v0 = vadd.f32 1.0, %v1081_v60  ;;  %v1319_v1 = vpop.f32.mrf.mxu0  ;;  %v292_v11 = vmul.f32 -0.5, %v1081_v60  ;;  %v295_v26 = vand.u32 2147483647, %v1081_v60 }
  0xa3   :  { %v282_v3 = vmul.f32 0.6931472, %v1083_v63  ;;  %1084 = vpow2.f32 %v245_v62  ;;  %v1322_v6 = vmul.f32 2.0, %v1319_v1  ;;  %v1034_v25 = vadd.f32 -0.6931472, %v447_v19  ;;  %v1355_v62 = vpop.f32.mrf.mxu3 }
  0xa4   :  { %1086 = vlog2.f32 %v289_v0  ;;  %v293_v22 = vadd.f32 1.0, %v292_v11  ;;  %vm296_vm6 = vcmp.lt.f32.partialorder %v295_v26, 0.0004427343 }
  0xa5   :  { %v288_v7 = vsel %vm287_vm2, %v285_v4, %v282_v3  ;;  %v211_v12 = vand.u32 2147483647, %v1322_v6  ;;  %vm179_vm13 = vcmp.ne.f32.partialorder %v1322_v6, %v1322_v6 }
  0xa6   :  { %v416_v9 = vadd.f32 %v288_v7, %v160_v5  ;;  %v294_v30 = vmul.f32 %v1081_v60, %v293_v22 }
  0xa7   :  { %v227_v17 = vsub.f32 0.0, %v211_v12 }
  0xa8   :  { %v432_v14 = vsel %vm176_vm4, %v144_v32, %v416_v9  ;;  %v1366_v9 = vmul.f32 2.0, %v1355_v62 }
  0xa9   :  { %v1085_v15 = vpop.eup %1084  ;;  %v448_v16 = vadd.f32 %v432_v14, %v128_v8  ;;  %v247_v24 = vmul.f32 1.442695, %v227_v17 }
  0xaa   :  { %v1087_v18 = vpop.eup %1086  ;;  %v298_v20 = vadd.f32 1.0, %v1085_v15  ;;  %v1330_v21 = vpop.f32.mrf.mxu0  ;;  %v301_v23 = vmul.f32 -0.5, %v1085_v15  ;;  %v304_v34 = vand.u32 2147483647, %v1085_v15 }
  0xab   :  { %v1035_v27 = vadd.f32 -0.6931472, %v448_v16  ;;  %v291_v28 = vmul.f32 0.6931472, %v1087_v18  ;;  %v1333_v29 = vmul.f32 2.0, %v1330_v21  ;;  %v1377_v26 = vpop.f32.mrf.mxu3 }
  0xac   :  { %1088 = vlog2.f32 %v298_v20  ;;  %v302_v31 = vadd.f32 1.0, %v301_v23  ;;  %vm305_vm7 = vcmp.lt.f32.partialorder %v304_v34, 0.0004427343 }
  0xad   :  { %1090 = vpow2.f32 %v247_v24  ;;  %v212_v32 = vand.u32 2147483647, %v1333_v29  ;;  %v479_v35 = vpack.c.bf16 %v1035_v27, %v1034_v25  ;;  %v297_v36 = vsel %vm296_vm6, %v294_v30, %v291_v28 }
  0xae   :  { %v303_v45 = vmul.f32 %v1085_v15, %v302_v31  ;;  %v417_v47 = vadd.f32 %v297_v36, %v161_v41  ;;  %v218_v24 = vand.u32 2147483647, %v1366_v9  ;;  %v164_v36 = vmax.f32 %v1333_v29, 0.0 }
  0xaf   :  { %v228_v37 = vsub.f32 0.0, %v212_v32  ;;  %1058 = vmatmul.msk.bf16.vlgmr.msra.gmra.mxu1 %vm507_vm5, %v479_v35  ;;  %v163_v32 = vmax.f32 %v1322_v6, 0.0  ;;  %vm180_vm12 = vcmp.ne.f32.partialorder %v1333_v29, %v1333_v29 }
  0xb0   :  { %v433_v57 = vsel %vm177_vm8, %v1309_v40, %v417_v47  ;;  %v1363_v40 = vmul.f32 2.0, %v1336_v33  ;;  %v234_v41 = vsub.f32 0.0, %v218_v24 }
  0xb1   :  { %v249_v46 = vmul.f32 1.442695, %v228_v37  ;;  %v449_v2 = vadd.f32 %v433_v57, %v129_v59 }
  0xb2   :  { %v1089_v38 = vpop.eup %1088  ;;  %v1340_v42 = vpop.f32.mrf.mxu0  ;;  %v217_v14 = vand.u32 2147483647, %v1363_v40  ;;  %v261_v57 = vmul.f32 1.442695, %v234_v41 }
  0xb3   :  { %v1091_v43 = vpop.eup %1090  ;;  %v300_v44 = vmul.f32 0.6931472, %v1089_v38  ;;  %1092 = vpow2.f32 %v249_v46  ;;  %v1344_v53 = vmul.f32 2.0, %v1340_v42  ;;  %v1036_v10 = vadd.f32 -0.6931472, %v449_v2 }
  0xb4   :  { %v307_v50 = vadd.f32 1.0, %v1091_v43  ;;  %v310_v63 = vmul.f32 -0.5, %v1091_v43  ;;  %v313_v11 = vand.u32 2147483647, %v1091_v43  ;;  %v233_v30 = vsub.f32 0.0, %v217_v14 }
  0xb5   :  { %v306_v51 = vsel %vm305_vm7, %v303_v45, %v300_v44  ;;  %v213_v56 = vand.u32 2147483647, %v1344_v53  ;;  %v165_v14 = vmax.f32 %v1344_v53, 0.0  ;;  %vm181_vm0 = vcmp.ne.f32.partialorder %v1344_v53, %v1344_v53 }
  0xb6   :  { %v418_v54 = vadd.f32 %v306_v51, %v162_v48  ;;  %1094 = vlog2.f32 %v307_v50  ;;  %v311_v8 = vadd.f32 1.0, %v310_v63  ;;  %vm1372_vm10 = vcmp.lt.f32.partialorder %v313_v11, 0.0004427343 }
  0xb7   :  { %v229_v61 = vsub.f32 0.0, %v213_v56  ;;  %v259_v46 = vmul.f32 1.442695, %v233_v30  ;;  %v132_v48 = vsub.f32 0.0, %v1330_v21 }
  0xb8   :  { %v434_v58 = vsel %vm178_vm9, %v1315_v52, %v418_v54  ;;  %v312_v18 = vmul.f32 %v1091_v43, %v311_v8  ;;  %vm185_vm9 = vcmp.ne.f32.partialorder %v1363_v40, %v1363_v40 }
  0xb9   :  { %v450_v60 = vadd.f32 %v434_v58, %v130_v55  ;;  %v1093_v49 = vpop.eup %1092  ;;  %v251_v3 = vmul.f32 1.442695, %v229_v61  ;;  %v131_v55 = vsub.f32 0.0, %v1319_v1 }
  0xba   :  { %v1357_v0 = vpop.f32.mrf.mxu0  ;;  %v316_v5 = vadd.f32 1.0, %v1093_v49  ;;  %v319_v39 = vmul.f32 -0.5, %v1093_v49  ;;  %v322_v19 = vand.u32 2147483647, %v1093_v49 }
  0xbb   :  { %v1360_v4 = vmul.f32 2.0, %v1357_v0  ;;  %v1037_v7 = vadd.f32 -0.6931472, %v450_v60  ;;  %1096 = vpow2.f32 %v251_v3  ;;  %v1401_v3 = vpop.f32.mrf.mxu3 }
  0xbc   :  { %v1095_v52 = vpop.eup %1094  ;;  %1098 = vlog2.f32 %v316_v5  ;;  %v320_v15 = vadd.f32 1.0, %v319_v39  ;;  %vm323_vm11 = vcmp.lt.f32.partialorder %v322_v19, 0.0004427343 }
  0xbd   :  { %v214_v12 = vand.u32 2147483647, %v1360_v4  ;;  %v309_v13 = vmul.f32 0.6931472, %v1095_v52  ;;  %v480_v17 = vpack.c.bf16 %v1037_v7, %v1036_v10  ;;  %vm182_vm1 = vcmp.ne.f32.partialorder %v1360_v4, %v1360_v4 }
  0xbe   :  { %v321_v35 = vmul.f32 %v1093_v49, %v320_v15  ;;  %v1408_v15 = vmul.f32 2.0, %v1377_v26 }
  0xbf   :  { %v230_v16 = vsub.f32 0.0, %v214_v12  ;;  %1059 = vmatmul.msk.bf16.gmra.mxu1 %vm507_vm5, %v480_v17  ;;  %v315_v25 = vsel %vm1372_vm10, %v312_v18, %v309_v13  ;;  %v1411_v17 = vmul.f32 2.0, %v1401_v3  ;;  %vm186_vm10 = vcmp.ne.f32.partialorder %v1366_v9, %v1366_v9 }
  0xc0   :  { %v419_v37 = vadd.f32 %v315_v25, %v163_v32  ;;  %v219_v32 = vand.u32 2147483647, %v1408_v15 }
  0xc1   :  { %v1097_v22 = vpop.eup %1096  ;;  %v253_v27 = vmul.f32 1.442695, %v230_v16 }
  0xc2   :  { %v1370_v20 = vpop.f32.mrf.mxu0  ;;  %v1099_v28 = vpop.eup %1098  ;;  %v325_v31 = vadd.f32 1.0, %v1097_v22  ;;  %v328_v45 = vmul.f32 -0.5, %v1097_v22  ;;  %v435_v56 = vsel %vm179_vm13, %v1322_v6, %v419_v37  ;;  %v331_v21 = vand.u32 2147483647, %v1097_v22 }
  0xc3   :  { %v318_v34 = vmul.f32 0.6931472, %v1099_v28  ;;  %1100 = vpow2.f32 %v253_v27  ;;  %v1385_v43 = vmul.f32 2.0, %v1370_v20  ;;  %v451_v5 = vadd.f32 %v435_v56, %v131_v55 }
  0xc4   :  { %1102 = vlog2.f32 %v325_v31  ;;  %v329_v61 = vadd.f32 1.0, %v328_v45  ;;  %vm332_vm14 = vcmp.lt.f32.partialorder %v331_v21, 0.0004427343  ;;  %v166_v28 = vmax.f32 %v1360_v4, 0.0 }
  0xc5   :  { %v324_v38 = vsel %vm323_vm11, %v321_v35, %v318_v34  ;;  %v215_v47 = vand.u32 2147483647, %v1385_v43  ;;  %1104 = vpow2.f32 %v259_v46  ;;  %v1038_v8 = vadd.f32 -0.6931472, %v451_v5  ;;  %v1419_v35 = vpop.f32.mrf.mxu3 }
  0xc6   :  { %v420_v44 = vadd.f32 %v324_v38, %v164_v36  ;;  %v330_v6 = vmul.f32 %v1097_v22, %v329_v61  ;;  %v220_v38 = vand.u32 2147483647, %v1411_v17  ;;  %v133_v45 = vsub.f32 0.0, %v1340_v42 }
  0xc7   :  { %v231_v58 = vsub.f32 0.0, %v215_v47  ;;  %vm183_vm3 = vcmp.ne.f32.partialorder %v1385_v43, %v1385_v43  ;;  %vm187_vm13 = vcmp.ne.f32.partialorder %v1408_v15, %v1408_v15 }
  0xc8   :  { %v436_v50 = vsel %vm180_vm12, %v1333_v29, %v420_v44  ;;  %v134_v44 = vsub.f32 0.0, %v1357_v0 }
  0xc9   :  { %v1101_v54 = vpop.eup %1100  ;;  %v452_v60 = vadd.f32 %v436_v50, %v132_v48  ;;  %v255_v29 = vmul.f32 1.442695, %v231_v58  ;;  %v235_v50 = vsub.f32 0.0, %v219_v32  ;;  %v135_v32 = vsub.f32 0.0, %v1370_v20 }
  0xca   :  { %v1394_v51 = vpop.f32.mrf.mxu0  ;;  %v1103_v59 = vpop.eup %1102  ;;  %v334_v63 = vadd.f32 1.0, %v1101_v54  ;;  %v337_v2 = vmul.f32 -0.5, %v1101_v54  ;;  %v340_v11 = vand.u32 2147483647, %v1101_v54 }
  0xcb   :  { %v1399_v49 = vmul.f32 2.0, %v1394_v51  ;;  %v327_v52 = vmul.f32 0.6931472, %v1103_v59  ;;  %v1039_v1 = vadd.f32 -0.6931472, %v452_v60  ;;  %v1404_v13 = vpop.eup %1104 }
  0xcc   :  { %1106 = vlog2.f32 %v334_v63  ;;  %v338_v39 = vadd.f32 1.0, %v337_v2  ;;  %vm341_vm15 = vcmp.lt.f32.partialorder %v340_v11, 0.0004427343  ;;  %v361_v30 = vadd.f32 1.0, %v1404_v13 }
  0xcd   :  { %1108 = vpow2.f32 %v255_v29  ;;  %v216_v7 = vand.u32 2147483647, %v1399_v49  ;;  %v333_v10 = vsel %vm332_vm14, %v330_v6, %v327_v52  ;;  %v481_v19 = vpack.c.bf16 %v1039_v1, %v1038_v8  ;;  %v1433_v5 = vpop.f32.mrf.mxu3 }
  0xce   :  { %1110 = vpow2.f32 %v261_v57  ;;  %v421_v22 = vadd.f32 %v333_v10, %v165_v14  ;;  %v339_v24 = vmul.f32 %v1101_v54, %v338_v39  ;;  %v236_v57 = vsub.f32 0.0, %v220_v38 }
  0xcf   :  { %v232_v12 = vsub.f32 0.0, %v216_v7  ;;  %1060 = vmatmul.msk.bf16.gmra.mxu1 %vm507_vm5, %v481_v19  ;;  %v263_v61 = vmul.f32 1.442695, %v235_v50  ;;  %v167_v29 = vmax.f32 %v1385_v43, 0.0  ;;  %v1437_v11 = vmul.f32 2.0, %v1419_v35 }
  0xd0   :  { %v437_v41 = vsel %vm181_vm0, %v1344_v53, %v421_v22  ;;  %v265_v2 = vmul.f32 1.442695, %v236_v57  ;;  %v1440_v14 = vmul.f32 2.0, %v1433_v5  ;;  %v367_v19 = vand.u32 2147483647, %v1404_v13 }
  0xd1   :  { %v257_v18 = vmul.f32 1.442695, %v232_v12  ;;  %v453_v55 = vadd.f32 %v437_v41, %v133_v45  ;;  %vm184_vm6 = vcmp.ne.f32.partialorder %v1399_v49, %v1399_v49  ;;  %v169_v57 = vmax.f32 %v1363_v40, 0.0 }
  0xd2   :  { %v1107_v16 = vpop.eup %1106  ;;  %vm1457_vm7 = vcmp.lt.f32.partialorder %v367_v19, 0.0004427343  ;;  %vm188_vm14 = vcmp.ne.f32.partialorder %v1411_v17, %v1411_v17 }
  0xd3   :  { %v336_v23 = vmul.f32 0.6931472, %v1107_v16  ;;  %v1109_v27 = vpop.eup %1108  ;;  %1112 = vpow2.f32 %v257_v18  ;;  %v1040_v42 = vadd.f32 -0.6931472, %v453_v55 }
  0xd4   :  { %v1415_v25 = vpop.eup %1110  ;;  %v343_v34 = vadd.f32 1.0, %v1109_v27  ;;  %v346_v37 = vmul.f32 -0.5, %v1109_v27  ;;  %v349_v53 = vand.u32 2147483647, %v1109_v27 }
  0xd5   :  { %v342_v31 = vsel %vm341_vm15, %v339_v24, %v336_v23  ;;  %v370_v46 = vadd.f32 1.0, %v1415_v25  ;;  %v373_v52 = vmul.f32 -0.5, %v1415_v25  ;;  %v376_v22 = vand.u32 2147483647, %v1415_v25 }
  0xd6   :  { %v422_v36 = vadd.f32 %v342_v31, %v166_v28  ;;  %1114 = vlog2.f32 %v343_v34  ;;  %v347_v56 = vadd.f32 1.0, %v346_v37  ;;  %vm350_vm2 = vcmp.lt.f32.partialorder %v349_v53, 0.0004427343 }
  0xd7   :  { %1116 = vlog2.f32 %v361_v30  ;;  %v374_v23 = vadd.f32 1.0, %v373_v52  ;;  %v168_v30 = vmax.f32 %v1399_v49, 0.0  ;;  %v221_v31 = vand.u32 2147483647, %v1437_v11 }
  0xd8   :  { %v438_v47 = vsel %vm182_vm1, %v1360_v4, %v422_v36  ;;  %1118 = vlog2.f32 %v370_v46  ;;  %v348_v21 = vmul.f32 %v1109_v27, %v347_v56  ;;  %v364_v4 = vmul.f32 -0.5, %v1404_v13 }
  0xd9   :  { %v454_v48 = vadd.f32 %v438_v47, %v134_v44  ;;  %v1113_v54 = vpop.eup %1112  ;;  %v222_v36 = vand.u32 2147483647, %v1440_v14  ;;  %v375_v47 = vmul.f32 %v1415_v25, %v374_v23  ;;  %vm1461_vm8 = vcmp.lt.f32.partialorder %v376_v22, 0.0004427343 }
  0xda   :  { %v352_v58 = vadd.f32 1.0, %v1113_v54  ;;  %v355_v59 = vmul.f32 -0.5, %v1113_v54  ;;  %v358_v10 = vand.u32 2147483647, %v1113_v54  ;;  %v365_v18 = vadd.f32 1.0, %v364_v4 }
  0xdb   :  { %v1041_v0 = vadd.f32 -0.6931472, %v454_v48  ;;  %v136_v48 = vsub.f32 0.0, %v1394_v51  ;;  %v238_v25 = vsub.f32 0.0, %v222_v36  ;;  %v170_v51 = vmax.f32 %v1366_v9, 0.0 }
  0xdc   :  { %v1115_v60 = vpop.eup %1114  ;;  %1120 = vlog2.f32 %v352_v58  ;;  %v356_v6 = vadd.f32 1.0, %v355_v59  ;;  %vm359_vm4 = vcmp.lt.f32.partialorder %v358_v10, 0.0004427343  ;;  %v366_v41 = vmul.f32 %v1404_v13, %v365_v18 }
  0xdd   :  { %v345_v63 = vmul.f32 0.6931472, %v1115_v60  ;;  %v482_v7 = vpack.c.bf16 %v1041_v0, %v1040_v42  ;;  %v1117_v39 = vpop.eup %1116  ;;  %1122 = vpow2.f32 %v263_v61  ;;  %v138_v52 = vsub.f32 0.0, %v1355_v62 }
  0xde   :  { %v1119_v12 = vpop.eup %1118  ;;  %1124 = vpow2.f32 %v265_v2  ;;  %v357_v27 = vmul.f32 %v1113_v54, %v356_v6  ;;  %v363_v38 = vmul.f32 0.6931472, %v1117_v39  ;;  %v237_v54 = vsub.f32 0.0, %v221_v31 }
  0xdf   :  { %v351_v1 = vsel %vm350_vm2, %v348_v21, %v345_v63  ;;  %1061 = vmatmul.msk.bf16.gmra.mxu1 %vm507_vm5, %v482_v7  ;;  %v372_v44 = vmul.f32 0.6931472, %v1119_v12  ;;  %v172_v31 = vmax.f32 %v1411_v17, 0.0  ;;  %vm189_vm1 = vcmp.ne.f32.partialorder %v1437_v11, %v1437_v11 }
  0xe0   :  { %v423_v8 = vadd.f32 %v351_v1, %v167_v29  ;;  %v369_v58 = vsel %vm1457_vm7, %v366_v41, %v363_v38  ;;  %v267_v61 = vmul.f32 1.442695, %v237_v54  ;;  %v137_v29 = vsub.f32 0.0, %v1336_v33 }
  0xe1   :  { %v378_v0 = vsel %vm1461_vm8, %v375_v47, %v372_v44  ;;  %v425_v63 = vadd.f32 %v369_v58, %v169_v57  ;;  %v140_v47 = vsub.f32 0.0, %v1401_v3  ;;  %vm190_vm2 = vcmp.ne.f32.partialorder %v1440_v14, %v1440_v14 }
  0xe2   :  { %v1121_v16 = vpop.eup %1120  ;;  %v439_v28 = vsel %vm183_vm3, %v1385_v43, %v423_v8  ;;  %v426_v21 = vadd.f32 %v378_v0, %v170_v51 }
  0xe3   :  { %v354_v24 = vmul.f32 0.6931472, %v1121_v16  ;;  %v1123_v37 = vpop.eup %1122  ;;  %v455_v43 = vadd.f32 %v439_v28, %v135_v32  ;;  %v441_v1 = vsel %vm185_vm9, %v1363_v40, %v425_v63  ;;  %v141_v63 = vsub.f32 0.0, %v1419_v35 }
  0xe4   :  { %v1125_v46 = vpop.eup %1124  ;;  %v379_v55 = vadd.f32 1.0, %v1123_v37  ;;  %v382_v2 = vmul.f32 -0.5, %v1123_v37  ;;  %v442_v6 = vsel %vm186_vm10, %v1366_v9, %v426_v21  ;;  %v385_v12 = vand.u32 2147483647, %v1123_v37 }
  0xe5   :  { %v360_v34 = vsel %vm359_vm4, %v357_v27, %v354_v24  ;;  %v388_v53 = vadd.f32 1.0, %v1125_v46  ;;  %v1042_v59 = vadd.f32 -0.6931472, %v455_v43  ;;  %v391_v4 = vmul.f32 -0.5, %v1125_v46 }
  0xe6   :  { %v424_v45 = vadd.f32 %v360_v34, %v168_v30  ;;  %1126 = vlog2.f32 %v379_v55  ;;  %v383_v39 = vadd.f32 1.0, %v382_v2  ;;  %v394_v16 = vand.u32 2147483647, %v1125_v46 }
  0xe7   :  { %1128 = vlog2.f32 %v388_v53  ;;  %v392_v8 = vadd.f32 1.0, %v391_v4  ;;  %v457_v18 = vadd.f32 %v441_v1, %v137_v29  ;;  %v458_v19 = vadd.f32 %v442_v6, %v138_v52 }
  0xe8   :  { %v440_v13 = vsel %vm184_vm6, %v1399_v49, %v424_v45  ;;  %v269_v49 = vmul.f32 1.442695, %v238_v25  ;;  %1130 = vpow2.f32 %v267_v61  ;;  %v384_v27 = vmul.f32 %v1123_v37, %v383_v39  ;;  %v1507_v39 = vld [vmem:[%s1666_s3] ss:$0 sm:$0xff] }
  0xe9   :  { %v456_v56 = vadd.f32 %v440_v13, %v136_v48  ;;  %v393_v28 = vmul.f32 %v1125_v46, %v392_v8  ;;  %vm386_vm11 = vcmp.lt.f32.partialorder %v385_v12, 0.0004427343  ;;  %vm395_vm12 = vcmp.lt.f32.partialorder %v394_v16, 0.0004427343 }
  0xea   :  { %1132 = vpow2.f32 %v269_v49  ;;  %v1044_v62 = vadd.f32 -0.6931472, %v457_v18  ;;  %v1045_v40 = vadd.f32 -0.6931472, %v458_v19  ;;  %v171_v9 = vmax.f32 %v1408_v15, 0.0 }
  0xeb   :  { %v1043_v60 = vadd.f32 -0.6931472, %v456_v56  ;;  %v139_v46 = vsub.f32 0.0, %v1377_v26  ;;  %v142_v21 = vsub.f32 0.0, %v1433_v5 }
  0xec   :  { %v1127_v7 = vpop.eup %1126  ;;  %v484_v38 = vpack.c.bf16 %v1045_v40, %v1044_v62 }
  0xed   :  { %v483_v42 = vpack.c.bf16 %v1043_v60, %v1042_v59  ;;  %v1129_v10 = vpop.eup %1128  ;;  %v381_v24 = vmul.f32 0.6931472, %v1127_v7 }
  0xee   :  { %v1131_v22 = vpop.eup %1130  ;;  %v390_v33 = vmul.f32 0.6931472, %v1129_v10 }
  0xef   :  { %1062 = vmatmul.msk.bf16.vlgmr.msra.gmra.mxu2 %vm507_vm5, %v483_v42  ;;  %v397_v30 = vadd.f32 1.0, %v1131_v22  ;;  %v387_v34 = vsel %vm386_vm11, %v384_v27, %v381_v24  ;;  %v400_v37 = vmul.f32 -0.5, %v1131_v22  ;;  %v403_v55 = vand.u32 2147483647, %v1131_v22 }
  0xf0   :  { %v1133_v23 = vpop.eup %1132  ;;  %v396_v36 = vsel %vm395_vm12, %v393_v28, %v390_v33  ;;  %v427_v41 = vadd.f32 %v387_v34, %v171_v9 }
  0xf1   :  { %v406_v32 = vadd.f32 1.0, %v1133_v23  ;;  %1134 = vlog2.f32 %v397_v30  ;;  %v428_v44 = vadd.f32 %v396_v36, %v172_v31  ;;  %v409_v45 = vmul.f32 -0.5, %v1133_v23 }
  0xf2   :  { %v443_v43 = vsel %vm187_vm13, %v1408_v15, %v427_v41  ;;  %v401_v50 = vadd.f32 1.0, %v400_v37  ;;  %v412_v56 = vand.u32 2147483647, %v1133_v23  ;;  %vm404_vm15 = vcmp.lt.f32.partialorder %v403_v55, 0.0004427343 }
  0xf3   :  { %1136 = vlog2.f32 %v406_v32  ;;  %v444_v48 = vsel %vm188_vm14, %v1411_v17, %v428_v44  ;;  %v410_v13 = vadd.f32 1.0, %v409_v45  ;;  %v459_v25 = vadd.f32 %v443_v43, %v139_v46 }
  0xf4   :  { %v460_v57 = vadd.f32 %v444_v48, %v140_v47  ;;  %v402_v53 = vmul.f32 %v1131_v22, %v401_v50  ;;  %vm413_vm0 = vcmp.lt.f32.partialorder %v412_v56, 0.0004427343  ;;  %v173_v15 = vmax.f32 %v1437_v11, 0.0  ;;  %v1521_v47 = vld [vmem:[%s1667_s4] ss:$0 sm:$0xff] }
  0xf5   :  { %v411_v0 = vmul.f32 %v1133_v23, %v410_v13  ;;  %v1046_v26 = vadd.f32 -0.6931472, %v459_v25  ;;  %v174_v17 = vmax.f32 %v1440_v14, 0.0 }
  0xf6   :  { %v1047_v3 = vadd.f32 -0.6931472, %v460_v57 }
  0xf7   :  { %v1135_v20 = vpop.eup %1134 }
  0xf8   :  { %v399_v51 = vmul.f32 0.6931472, %v1135_v20  ;;  %v485_v61 = vpack.c.bf16 %v1047_v3, %v1046_v26 }
  0xf9   :  { %v1137_v54 = vpop.eup %1136 }
  0xfa   :  { %v408_v58 = vmul.f32 0.6931472, %v1137_v54  ;;  %v405_v59 = vsel %vm404_vm15, %v402_v53, %v399_v51 }
  0xfb   :  { %v429_v49 = vadd.f32 %v405_v59, %v173_v15 }
  0xfc   :  { %v414_v60 = vsel %vm413_vm0, %v411_v0, %v408_v58 }
  0xfd   :  { %v430_v42 = vadd.f32 %v414_v60, %v174_v17  ;;  %v445_v2 = vsel %vm189_vm1, %v1437_v11, %v429_v49 }
  0xfe   :  { %v461_v29 = vadd.f32 %v445_v2, %v141_v63 }
  0xff   :  { %1063 = vmatmul.msk.bf16.gmra.mxu2 %vm507_vm5, %v484_v38  ;;  %v446_v4 = vsel %vm190_vm2, %v1440_v14, %v430_v42 }
 0x100   :  { %v462_v52 = vadd.f32 %v446_v4, %v142_v21  ;;  %v1048_v1 = vadd.f32 -0.6931472, %v461_v29 }
 0x102   :  { %v1049_v6 = vadd.f32 -0.6931472, %v462_v52 }
 0x104   :  { %v486_v7 = vpack.c.bf16 %v1049_v6, %v1048_v1 }
 0x10f   :  { %1064 = vmatmul.msk.bf16.gmra.mxu2 %vm507_vm5, %v485_v61 }
 0x11f   :  { %1065 = vmatmul.msk.bf16.gmra.mxu2 %vm507_vm5, %v486_v7 }
 0x12c   :  { %v541_v8 = vpop.f32.mrf.mxu1 }
 0x12d   :  { %v542_v35 = vadd.f32 %v1507_v39, %v541_v8 }
 0x12f   :  { %v629_v5 = vand.u32 2147483647, %v542_v35  ;;  %v581_v36 = vmax.f32 %v542_v35, 0.0  ;;  %vm597_vm4 = vcmp.ne.f32.partialorder %v542_v35, %v542_v35 }
 0x131   :  { %v645_v10 = vsub.f32 0.0, %v629_v5 }
 0x133   :  { %v661_v11 = vmul.f32 1.442695, %v645_v10 }
 0x134   :  { %v543_v12 = vpop.f32.mrf.mxu1 }
 0x135   :  { %1138 = vpow2.f32 %v661_v11  ;;  %v544_v14 = vadd.f32 %v1507_v39, %v543_v12 }
 0x137   :  { %v630_v16 = vand.u32 2147483647, %v544_v14  ;;  %v582_v3 = vmax.f32 %v544_v14, 0.0  ;;  %vm598_vm7 = vcmp.ne.f32.partialorder %v544_v14, %v544_v14 }
 0x139   :  { %v646_v18 = vsub.f32 0.0, %v630_v16 }
 0x13b   :  { %v1139_v19 = vpop.eup %1138  ;;  %v663_v22 = vmul.f32 1.442695, %v646_v18 }
 0x13c   :  { %v693_v23 = vadd.f32 1.0, %v1139_v19  ;;  %v546_v24 = vpop.f32.mrf.mxu1  ;;  %v696_v27 = vmul.f32 -0.5, %v1139_v19  ;;  %v699_v30 = vand.u32 2147483647, %v1139_v19 }
 0x13d   :  { %1140 = vpow2.f32 %v663_v22  ;;  %v1512_v33 = vadd.f32 %v1507_v39, %v546_v24 }
 0x13e   :  { %1142 = vlog2.f32 %v693_v23  ;;  %v697_v62 = vadd.f32 1.0, %v696_v27  ;;  %vm700_vm3 = vcmp.lt.f32.partialorder %v699_v30, 0.0004427343 }
 0x13f   :  { %v631_v28 = vand.u32 2147483647, %v1512_v33  ;;  %vm599_vm9 = vcmp.ne.f32.partialorder %v1512_v33, %v1512_v33 }
 0x140   :  { %v698_v44 = vmul.f32 %v1139_v19, %v697_v62 }
 0x141   :  { %v647_v40 = vsub.f32 0.0, %v631_v28 }
 0x143   :  { %v1141_v9 = vpop.eup %1140  ;;  %v665_v32 = vmul.f32 1.442695, %v647_v40 }
 0x144   :  { %v1143_v31 = vpop.eup %1142  ;;  %v702_v34 = vadd.f32 1.0, %v1141_v9  ;;  %v548_v38 = vpop.f32.mrf.mxu1  ;;  %v705_v45 = vmul.f32 -0.5, %v1141_v9  ;;  %v708_v55 = vand.u32 2147483647, %v1141_v9 }
 0x145   :  { %v695_v41 = vmul.f32 0.6931472, %v1143_v31  ;;  %1144 = vpow2.f32 %v665_v32  ;;  %v1516_v37 = vadd.f32 %v1507_v39, %v548_v38 }
 0x146   :  { %1146 = vlog2.f32 %v702_v34  ;;  %v706_v13 = vadd.f32 1.0, %v705_v45  ;;  %vm709_vm6 = vcmp.lt.f32.partialorder %v708_v55, 0.0004427343 }
 0x147   :  { %v701_v46 = vsel %vm700_vm3, %v698_v44, %v695_v41  ;;  %v632_v43 = vand.u32 2147483647, %v1516_v37  ;;  %vm600_vm11 = vcmp.ne.f32.partialorder %v1516_v37, %v1516_v37 }
 0x148   :  { %v837_v48 = vadd.f32 %v701_v46, %v581_v36  ;;  %v707_v0 = vmul.f32 %v1141_v9, %v706_v13  ;;  %v584_v9 = vmax.f32 %v1516_v37, 0.0 }
 0x149   :  { %v648_v20 = vsub.f32 0.0, %v632_v43 }
 0x14a   :  { %v853_v50 = vsel %vm597_vm4, %v542_v35, %v837_v48  ;;  %v583_v35 = vmax.f32 %v1512_v33, 0.0 }
 0x14b   :  { %v873_v54 = vmul.f32 %v1521_v47, %v853_v50  ;;  %v1145_v56 = vpop.eup %1144  ;;  %v667_v25 = vmul.f32 1.442695, %v648_v20 }
 0x14c   :  { %v1147_v57 = vpop.eup %1146  ;;  %v711_v53 = vadd.f32 1.0, %v1145_v56  ;;  %v714_v26 = vmul.f32 -0.5, %v1145_v56  ;;  %v551_v15 = vpop.f32.mrf.mxu1  ;;  %v717_v63 = vand.u32 2147483647, %v1145_v56 }
 0x14d   :  { %v889_v51 = vsel %vm507_vm5, %v873_v54, 0.0  ;;  %1148 = vpow2.f32 %v667_v25  ;;  %v704_v58 = vmul.f32 0.6931472, %v1147_v57  ;;  %v1527_v59 = vadd.f32 %v1507_v39, %v551_v15 }
 0x14e   :  { %890 = vadd.xlane.f32.xlu0 %v889_v51  ;;  %1150 = vlog2.f32 %v711_v53  ;;  %v715_v61 = vadd.f32 1.0, %v714_v26  ;;  %vm718_vm8 = vcmp.lt.f32.partialorder %v717_v63, 0.0004427343 }
 0x14f   :  { %v710_v17 = vsel %vm709_vm6, %v707_v0, %v704_v58  ;;  %v633_v49 = vand.u32 2147483647, %v1527_v59  ;;  %v585_v58 = vmax.f32 %v1527_v59, 0.0  ;;  %vm601_vm13 = vcmp.ne.f32.partialorder %v1527_v59, %v1527_v59 }
 0x150   :  { %v838_v60 = vadd.f32 %v710_v17, %v582_v3  ;;  %v716_v7 = vmul.f32 %v1145_v56, %v715_v61 }
 0x151   :  { %v649_v29 = vsub.f32 0.0, %v633_v49 }
 0x152   :  { %v854_v42 = vsel %vm598_vm7, %v544_v14, %v838_v60 }
 0x153   :  { %v1149_v21 = vpop.eup %1148  ;;  %v874_v2 = vmul.f32 %v1521_v47, %v854_v42  ;;  %v669_v5 = vmul.f32 1.442695, %v649_v29 }
 0x154   :  { %v1151_v4 = vpop.eup %1150  ;;  %v720_v52 = vadd.f32 1.0, %v1149_v21  ;;  %v723_v8 = vmul.f32 -0.5, %v1149_v21  ;;  %v553_v10 = vpop.f32.mrf.mxu1  ;;  %v726_v22 = vand.u32 2147483647, %v1149_v21 }
 0x155   :  { %v892_v1 = vsel %vm507_vm5, %v874_v2, 0.0  ;;  %v713_v6 = vmul.f32 0.6931472, %v1151_v4  ;;  %v1534_v12 = vadd.f32 %v1507_v39, %v553_v10 }
 0x156   :  { %893 = vadd.xlane.f32.xlu0 %v892_v1  ;;  %1152 = vlog2.f32 %v720_v52  ;;  %v724_v16 = vadd.f32 1.0, %v723_v8  ;;  %vm727_vm10 = vcmp.lt.f32.partialorder %v726_v22, 0.0004427343 }
 0x157   :  { %v719_v11 = vsel %vm718_vm8, %v716_v7, %v713_v6  ;;  %1154 = vpow2.f32 %v669_v5  ;;  %v634_v18 = vand.u32 2147483647, %v1534_v12  ;;  %v586_v6 = vmax.f32 %v1534_v12, 0.0 }
 0x158   :  { %v839_v14 = vadd.f32 %v719_v11, %v583_v35  ;;  %v725_v40 = vmul.f32 %v1149_v21, %v724_v16  ;;  %vm602_vm15 = vcmp.ne.f32.partialorder %v1534_v12, %v1534_v12 }
 0x159   :  { %v650_v27 = vsub.f32 0.0, %v634_v18 }
 0x15a   :  { %v855_v19 = vsel %vm599_vm9, %v1512_v33, %v839_v14 }
 0x15b   :  { %v875_v23 = vmul.f32 %v1521_v47, %v855_v19  ;;  %v671_v31 = vmul.f32 1.442695, %v650_v27 }
 0x15c   :  { %v1153_v24 = vpop.eup %1152  ;;  %v556_v32 = vpop.f32.mrf.mxu1 }
 0x15d   :  { %v895_v28 = vsel %vm507_vm5, %v875_v23, 0.0  ;;  %v722_v62 = vmul.f32 0.6931472, %v1153_v24  ;;  %v1155_v30 = vpop.eup %1154  ;;  %1156 = vpow2.f32 %v671_v31  ;;  %v1544_v33 = vadd.f32 %v1507_v39, %v556_v32 }
 0x15e   :  { %896 = vadd.xlane.f32.xlu1 %v895_v28  ;;  %v729_v36 = vadd.f32 1.0, %v1155_v30  ;;  %v732_v38 = vmul.f32 -0.5, %v1155_v30  ;;  %v735_v50 = vand.u32 2147483647, %v1155_v30 }
 0x15f   :  { %v728_v34 = vsel %vm727_vm10, %v725_v40, %v722_v62  ;;  %v635_v44 = vand.u32 2147483647, %v1544_v33  ;;  %vm603_vm1 = vcmp.ne.f32.partialorder %v1544_v33, %v1544_v33 }
 0x160   :  { %v840_v41 = vadd.f32 %v728_v34, %v584_v9  ;;  %1158 = vlog2.f32 %v729_v36  ;;  %v733_v43 = vadd.f32 1.0, %v732_v38  ;;  %vm736_vm12 = vcmp.lt.f32.partialorder %v735_v50, 0.0004427343 }
 0x161   :  { %v651_v48 = vsub.f32 0.0, %v635_v44 }
 0x162   :  { %v856_v45 = vsel %vm600_vm11, %v1516_v37, %v840_v41  ;;  %v734_v25 = vmul.f32 %v1155_v30, %v733_v43  ;;  %v587_v30 = vmax.f32 %v1544_v33, 0.0 }
 0x163   :  { %v876_v46 = vmul.f32 %v1521_v47, %v856_v45  ;;  %v1157_v13 = vpop.eup %1156  ;;  %v673_v54 = vmul.f32 1.442695, %v651_v48 }
 0x164   :  { %v558_v56 = vpop.f32.mrf.mxu1  ;;  %v738_v57 = vadd.f32 1.0, %v1157_v13  ;;  %v741_v37 = vmul.f32 -0.5, %v1157_v13  ;;  %v744_v61 = vand.u32 2147483647, %v1157_v13 }
 0x165   :  { %v898_v20 = vsel %vm507_vm5, %v876_v46, 0.0  ;;  %1160 = vpow2.f32 %v673_v54  ;;  %v1553_v51 = vadd.f32 %v1507_v39, %v558_v56 }
 0x166   :  { %899 = vadd.xlane.f32.xlu1 %v898_v20  ;;  %v1159_v55 = vpop.eup %1158  ;;  %1162 = vlog2.f32 %v738_v57  ;;  %v742_v17 = vadd.f32 1.0, %v741_v37  ;;  %vm745_vm14 = vcmp.lt.f32.partialorder %v744_v61, 0.0004427343 }
 0x167   :  { %v731_v53 = vmul.f32 0.6931472, %v1159_v55  ;;  %v636_v0 = vand.u32 2147483647, %v1553_v51  ;;  %v588_v54 = vmax.f32 %v1553_v51, 0.0  ;;  %vm604_vm3 = vcmp.ne.f32.partialorder %v1553_v51, %v1553_v51 }
 0x168   :  { %v743_v1 = vmul.f32 %v1157_v13, %v742_v17 }
 0x169   :  { %v737_v26 = vsel %vm736_vm12, %v734_v25, %v731_v53  ;;  %v652_v15 = vsub.f32 0.0, %v636_v0 }
 0x16a   :  { %v841_v3 = vadd.f32 %v737_v26, %v585_v58 }
 0x16b   :  { %v1161_v49 = vpop.eup %1160  ;;  %v675_v42 = vmul.f32 1.442695, %v652_v15 }
 0x16c   :  { %v857_v60 = vsel %vm601_vm13, %v1527_v59, %v841_v3  ;;  %v1163_v21 = vpop.eup %1162  ;;  %v747_v2 = vadd.f32 1.0, %v1161_v49  ;;  %v750_v4 = vmul.f32 -0.5, %v1161_v49  ;;  %v753_v14 = vand.u32 2147483647, %v1161_v49 }
 0x16d   :  { %v877_v63 = vmul.f32 %v1521_v47, %v857_v60  ;;  %1164 = vpow2.f32 %v675_v42  ;;  %v740_v52 = vmul.f32 0.6931472, %v1163_v21 }
 0x16e   :  { %1166 = vlog2.f32 %v747_v2  ;;  %v751_v5 = vadd.f32 1.0, %v750_v4  ;;  %vm754_vm0 = vcmp.lt.f32.partialorder %v753_v14, 0.0004427343 }
 0x16f   :  { %v901_v29 = vsel %vm507_vm5, %v877_v63, 0.0  ;;  %v746_v8 = vsel %vm745_vm14, %v743_v1, %v740_v52 }
 0x170   :  { %902 = vadd.xlane.f32.xlu2 %v901_v29  ;;  %v842_v35 = vadd.f32 %v746_v8, %v586_v6  ;;  %v752_v23 = vmul.f32 %v1161_v49, %v751_v5 }
 0x172   :  { %v561_v7 = vpop.f32.mrf.mxu2  ;;  %v858_v11 = vsel %vm602_vm15, %v1534_v12, %v842_v35 }
 0x173   :  { %v1564_v59 = vadd.f32 %v1507_v39, %v561_v7  ;;  %v1165_v16 = vpop.eup %1164  ;;  %v878_v19 = vmul.f32 %v1521_v47, %v858_v11 }
 0x174   :  { %v1167_v22 = vpop.eup %1166  ;;  %v756_v24 = vadd.f32 1.0, %v1165_v16  ;;  %v759_v40 = vmul.f32 -0.5, %v1165_v16  ;;  %v762_v41 = vand.u32 2147483647, %v1165_v16 }
 0x175   :  { %v637_v10 = vand.u32 2147483647, %v1564_v59  ;;  %v904_v28 = vsel %vm507_vm5, %v878_v19, 0.0  ;;  %v749_v62 = vmul.f32 0.6931472, %v1167_v22  ;;  %v589_v29 = vmax.f32 %v1564_v59, 0.0 }
 0x176   :  { %1168 = vlog2.f32 %v756_v24  ;;  %v760_v36 = vadd.f32 1.0, %v759_v40  ;;  %vm763_vm2 = vcmp.lt.f32.partialorder %v762_v41, 0.0004427343  ;;  %vm605_vm6 = vcmp.ne.f32.partialorder %v1564_v59, %v1564_v59 }
 0x177   :  { %v653_v18 = vsub.f32 0.0, %v637_v10  ;;  %v755_v31 = vsel %vm754_vm0, %v752_v23, %v749_v62 }
 0x178   :  { %905 = vadd.xlane.f32.xlu2 %v904_v28  ;;  %v843_v32 = vadd.f32 %v755_v31, %v587_v30  ;;  %v761_v13 = vmul.f32 %v1165_v16, %v760_v36 }
 0x179   :  { %v677_v27 = vmul.f32 1.442695, %v653_v18 }
 0x17a   :  { %v563_v9 = vpop.f32.mrf.mxu2  ;;  %v859_v38 = vsel %vm603_vm1, %v1544_v33, %v843_v32 }
 0x17b   :  { %1170 = vpow2.f32 %v677_v27  ;;  %v1574_v12 = vadd.f32 %v1507_v39, %v563_v9  ;;  %v879_v45 = vmul.f32 %v1521_v47, %v859_v38 }
 0x17c   :  { %v1169_v46 = vpop.eup %1168 }
 0x17d   :  { %v638_v34 = vand.u32 2147483647, %v1574_v12  ;;  %v907_v20 = vsel %vm507_vm5, %v879_v45, 0.0  ;;  %v758_v50 = vmul.f32 0.6931472, %v1169_v46  ;;  %v590_v62 = vmax.f32 %v1574_v12, 0.0 }
 0x17e   :  { %908 = vadd.xlane.f32.xlu0 %v907_v20  ;;  %vm606_vm8 = vcmp.ne.f32.partialorder %v1574_v12, %v1574_v12 }
 0x17f   :  { %v654_v44 = vsub.f32 0.0, %v638_v34  ;;  %v764_v25 = vsel %vm763_vm2, %v761_v13, %v758_v50 }
 0x180   :  { %v844_v53 = vadd.f32 %v764_v25, %v588_v54 }
 0x181   :  { %v1171_v43 = vpop.eup %1170  ;;  %v679_v48 = vmul.f32 1.442695, %v654_v44 }
 0x182   :  { %v566_v55 = vpop.f32.mrf.mxu2  ;;  %v765_v56 = vadd.f32 1.0, %v1171_v43  ;;  %v768_v57 = vmul.f32 -0.5, %v1171_v43  ;;  %v860_v58 = vsel %vm604_vm3, %v1553_v51, %v844_v53  ;;  %v771_v15 = vand.u32 2147483647, %v1171_v43 }
 0x183   :  { %1172 = vpow2.f32 %v679_v48  ;;  %v1584_v33 = vadd.f32 %v1507_v39, %v566_v55  ;;  %v880_v26 = vmul.f32 %v1521_v47, %v860_v58 }
 0x184   :  { %1174 = vlog2.f32 %v765_v56  ;;  %v769_v3 = vadd.f32 1.0, %v768_v57  ;;  %vm772_vm4 = vcmp.lt.f32.partialorder %v771_v15, 0.0004427343 }
 0x185   :  { %v639_v37 = vand.u32 2147483647, %v1584_v33  ;;  %v910_v61 = vsel %vm507_vm5, %v880_v26, 0.0  ;;  %v591_v54 = vmax.f32 %v1584_v33, 0.0  ;;  %vm607_vm10 = vcmp.ne.f32.partialorder %v1584_v33, %v1584_v33 }
 0x186   :  { %911 = vadd.xlane.f32.xlu1 %v910_v61  ;;  %v770_v51 = vmul.f32 %v1171_v43, %v769_v3 }
 0x187   :  { %v655_v0 = vsub.f32 0.0, %v639_v37 }
 0x189   :  { %v1173_v17 = vpop.eup %1172  ;;  %v681_v60 = vmul.f32 1.442695, %v655_v0 }
 0x18a   :  { %v1175_v49 = vpop.eup %1174  ;;  %v568_v42 = vpop.f32.mrf.mxu2  ;;  %v774_v63 = vadd.f32 1.0, %v1173_v17  ;;  %v777_v21 = vmul.f32 -0.5, %v1173_v17  ;;  %v780_v5 = vand.u32 2147483647, %v1173_v17 }
 0x18b   :  { %1176 = vpow2.f32 %v681_v60  ;;  %v1593_v2 = vadd.f32 %v1507_v39, %v568_v42  ;;  %v767_v4 = vmul.f32 0.6931472, %v1175_v49 }
 0x18c   :  { %1178 = vlog2.f32 %v774_v63  ;;  %v778_v7 = vadd.f32 1.0, %v777_v21  ;;  %vm781_vm7 = vcmp.lt.f32.partialorder %v780_v5, 0.0004427343 }
 0x18d   :  { %v640_v52 = vand.u32 2147483647, %v1593_v2  ;;  %v773_v1 = vsel %vm772_vm4, %v770_v51, %v767_v4  ;;  %v592_v21 = vmax.f32 %v1593_v2, 0.0  ;;  %vm608_vm12 = vcmp.ne.f32.partialorder %v1593_v2, %v1593_v2 }
 0x18e   :  { %v845_v6 = vadd.f32 %v773_v1, %v589_v29  ;;  %v779_v19 = vmul.f32 %v1173_v17, %v778_v7 }
 0x18f   :  { %v656_v8 = vsub.f32 0.0, %v640_v52 }
 0x190   :  { %v861_v35 = vsel %vm605_vm6, %v1564_v59, %v845_v6  ;;  %vm962_vm6 = vcmask 195712  }
 0x191   :  { %v1177_v10 = vpop.eup %1176  ;;  %v683_v11 = vmul.f32 1.442695, %v656_v8  ;;  %v881_v14 = vmul.f32 %v1521_v47, %v861_v35 }
 0x192   :  { %v1179_v16 = vpop.eup %1178  ;;  %v571_v18 = vpop.f32.mrf.mxu2  ;;  %v783_v22 = vadd.f32 1.0, %v1177_v10  ;;  %v786_v23 = vmul.f32 -0.5, %v1177_v10  ;;  %v789_v34 = vand.u32 2147483647, %v1177_v10 }
 0x193   :  { %1180 = vpow2.f32 %v683_v11  ;;  %v1602_v24 = vadd.f32 %v1507_v39, %v571_v18  ;;  %v913_v27 = vsel %vm507_vm5, %v881_v14, 0.0  ;;  %v776_v28 = vmul.f32 0.6931472, %v1179_v16 }
 0x194   :  { %914 = vadd.xlane.f32.xlu2 %v913_v27  ;;  %1182 = vlog2.f32 %v783_v22  ;;  %v787_v9 = vadd.f32 1.0, %v786_v23  ;;  %vm790_vm9 = vcmp.lt.f32.partialorder %v789_v34, 0.0004427343 }
 0x195   :  { %v641_v59 = vand.u32 2147483647, %v1602_v24  ;;  %v782_v40 = vsel %vm781_vm7, %v779_v19, %v776_v28  ;;  %v593_v23 = vmax.f32 %v1602_v24, 0.0  ;;  %vm609_vm14 = vcmp.ne.f32.partialorder %v1602_v24, %v1602_v24 }
 0x196   :  { %v846_v30 = vadd.f32 %v782_v40, %v590_v62  ;;  %v788_v46 = vmul.f32 %v1177_v10, %v787_v9  ;;  %vm966_vm7 = vcmask 261312  }
 0x197   :  { %v657_v31 = vsub.f32 0.0, %v641_v59 }
 0x198   :  { %v862_v32 = vsel %vm606_vm8, %v1574_v12, %v846_v30  ;;  %vm970_vm8 = vcmask 326912  }
 0x199   :  { %v1181_v36 = vpop.eup %1180  ;;  %v685_v38 = vmul.f32 1.442695, %v657_v31  ;;  %v882_v41 = vmul.f32 %v1521_v47, %v862_v32 }
 0x19a   :  { %v1183_v44 = vpop.eup %1182  ;;  %v573_v45 = vpop.f32.mrf.mxu2  ;;  %v792_v43 = vadd.f32 1.0, %v1181_v36  ;;  %v795_v48 = vmul.f32 -0.5, %v1181_v36  ;;  %v798_v37 = vand.u32 2147483647, %v1181_v36 }
 0x19b   :  { %1184 = vpow2.f32 %v685_v38  ;;  %v1612_v20 = vadd.f32 %v1507_v39, %v573_v45  ;;  %v916_v50 = vsel %vm507_vm5, %v882_v41, 0.0  ;;  %v785_v13 = vmul.f32 0.6931472, %v1183_v44 }
 0x19c   :  { %917 = vadd.xlane.f32.xlu0 %v916_v50  ;;  %1186 = vlog2.f32 %v792_v43  ;;  %v796_v25 = vadd.f32 1.0, %v795_v48  ;;  %vm799_vm11 = vcmp.lt.f32.partialorder %v798_v37, 0.0004427343 }
 0x19d   :  { %v642_v12 = vand.u32 2147483647, %v1612_v20  ;;  %v791_v55 = vsel %vm790_vm9, %v788_v46, %v785_v13  ;;  %v594_v45 = vmax.f32 %v1612_v20, 0.0  ;;  %vm610_vm0 = vcmp.ne.f32.partialorder %v1612_v20, %v1612_v20 }
 0x19e   :  { %v847_v56 = vadd.f32 %v791_v55, %v591_v54  ;;  %v797_v17 = vmul.f32 %v1181_v36, %v796_v25  ;;  %vm974_vm9 = vcmask 392512  }
 0x19f   :  { %v658_v57 = vsub.f32 0.0, %v642_v12 }
 0x1a0   :  { %v863_v53 = vsel %vm607_vm10, %v1584_v33, %v847_v56  ;;  %vm978_vm10 = vcmask 458112  }
 0x1a1   :  { %v1185_v58 = vpop.eup %1184  ;;  %v687_v0 = vmul.f32 1.442695, %v658_v57  ;;  %v883_v26 = vmul.f32 %v1521_v47, %v863_v53 }
 0x1a2   :  { %v1187_v3 = vpop.eup %1186  ;;  %v576_v15 = vpop.f32.mrf.mxu2  ;;  %v801_v60 = vadd.f32 1.0, %v1185_v58  ;;  %v804_v61 = vmul.f32 -0.5, %v1185_v58  ;;  %v807_v6 = vand.u32 2147483647, %v1185_v58 }
 0x1a3   :  { %1188 = vpow2.f32 %v687_v0  ;;  %v1622_v49 = vadd.f32 %v1507_v39, %v576_v15  ;;  %v919_v42 = vsel %vm507_vm5, %v883_v26, 0.0  ;;  %v794_v63 = vmul.f32 0.6931472, %v1187_v3 }
 0x1a4   :  { %920 = vadd.xlane.f32.xlu1 %v919_v42  ;;  %1190 = vlog2.f32 %v801_v60  ;;  %v805_v29 = vadd.f32 1.0, %v804_v61  ;;  %vm808_vm13 = vcmp.lt.f32.partialorder %v807_v6, 0.0004427343 }
 0x1a5   :  { %v643_v33 = vand.u32 2147483647, %v1622_v49  ;;  %v800_v4 = vsel %vm799_vm11, %v797_v17, %v794_v63  ;;  %v595_v37 = vmax.f32 %v1622_v49, 0.0  ;;  %vm611_vm2 = vcmp.ne.f32.partialorder %v1622_v49, %v1622_v49 }
 0x1a6   :  { %v848_v51 = vadd.f32 %v800_v4, %v592_v21  ;;  %v806_v11 = vmul.f32 %v1185_v58, %v805_v29  ;;  %vm982_vm11 = vcmask 523712  }
 0x1a7   :  { %v659_v52 = vsub.f32 0.0, %v643_v33 }
 0x1a8   :  { %v864_v1 = vsel %vm608_vm12, %v1593_v2, %v848_v51  ;;  %vm986_vm12 = vcmask 589312  }
 0x1a9   :  { %v1189_v7 = vpop.eup %1188  ;;  %v689_v8 = vmul.f32 1.442695, %v659_v52  ;;  %v884_v35 = vmul.f32 %v1521_v47, %v864_v1 }
 0x1aa   :  { %v1191_v5 = vpop.eup %1190  ;;  %v578_v10 = vpop.f32.mrf.mxu2  ;;  %v810_v14 = vadd.f32 1.0, %v1189_v7  ;;  %v813_v16 = vmul.f32 -0.5, %v1189_v7  ;;  %v816_v40 = vand.u32 2147483647, %v1189_v7 }
 0x1ab   :  { %1192 = vpow2.f32 %v689_v8  ;;  %v1632_v18 = vadd.f32 %v1507_v39, %v578_v10  ;;  %v922_v19 = vsel %vm507_vm5, %v884_v35, 0.0  ;;  %v803_v22 = vmul.f32 0.6931472, %v1191_v5 }
 0x1ac   :  { %923 = vadd.xlane.f32.xlu2 %v922_v19  ;;  %1194 = vlog2.f32 %v810_v14  ;;  %v814_v62 = vadd.f32 1.0, %v813_v16  ;;  %vm817_vm15 = vcmp.lt.f32.partialorder %v816_v40, 0.0004427343  ;;  %v953_v35 = vlaneseq }
 0x1ad   :  { %v644_v2 = vand.u32 2147483647, %v1632_v18  ;;  %v809_v27 = vsel %vm808_vm13, %v806_v11, %v803_v22  ;;  %v596_v63 = vmax.f32 %v1632_v18, 0.0  ;;  %vm612_vm4 = vcmp.ne.f32.partialorder %v1632_v18, %v1632_v18 }
 0x1ae   :  { %v849_v28 = vadd.f32 %v809_v27, %v593_v23  ;;  %v815_v34 = vmul.f32 %v1189_v7, %v814_v62  ;;  %v954_v11 = vand.u32 127, %v953_v35  ;;  %vm990_vm13 = vcmask 654912  }
 0x1af   :  { %v660_v59 = vsub.f32 0.0, %v644_v2 }
 0x1b0   :  { %v865_v39 = vsel %vm609_vm14, %v1602_v24, %v849_v28  ;;  %v956_v16 = vadd.s32 4294967288, %v954_v11  ;;  %v960_v19 = vadd.s32 4294967280, %v954_v11  ;;  %v964_v22 = vadd.s32 4294967272, %v954_v11 }
 0x1b1   :  { %v1193_v30 = vpop.eup %1192  ;;  %v691_v9 = vmul.f32 1.442695, %v660_v59  ;;  %v885_v31 = vmul.f32 %v1521_v47, %v865_v39  ;;  %v972_v2 = vadd.s32 4294967256, %v954_v11  ;;  %v976_v28 = vadd.s32 4294967248, %v954_v11 }
 0x1b2   :  { %v1195_v32 = vpop.eup %1194  ;;  %v819_v36 = vadd.f32 1.0, %v1193_v30  ;;  %v822_v44 = vmul.f32 -0.5, %v1193_v30  ;;  %v825_v50 = vand.u32 2147483647, %v1193_v30  ;;  %v980_v40 = vadd.s32 4294967240, %v954_v11 }
 0x1b3   :  { %1196 = vpow2.f32 %v691_v9  ;;  %v925_v38 = vsel %vm507_vm5, %v885_v31, 0.0  ;;  %v812_v41 = vmul.f32 0.6931472, %v1195_v32  ;;  %v984_v31 = vadd.s32 4294967232, %v954_v11 }
 0x1b4   :  { %926 = vadd.xlane.f32.xlu0 %v925_v38  ;;  %1198 = vlog2.f32 %v819_v36  ;;  %v823_v43 = vadd.f32 1.0, %v822_v44  ;;  %vm826_vm1 = vcmp.lt.f32.partialorder %v825_v50, 0.0004427343  ;;  %v988_v36 = vadd.s32 4294967224, %v954_v11 }
 0x1b5   :  { %v818_v46 = vsel %vm817_vm15, %v815_v34, %v812_v41  ;;  %v992_v44 = vadd.s32 4294967216, %v954_v11  ;;  %v1000_v50 = vadd.s32 4294967200, %v954_v11  ;;  %vm994_vm14 = vcmask 720512  }
 0x1b6   :  { %v850_v24 = vadd.f32 %v818_v46, %v594_v45  ;;  %v824_v57 = vmul.f32 %v1193_v30, %v823_v43  ;;  %vm998_vm15 = vcmask 786112  }
 0x1b8   :  { %v866_v48 = vsel %vm610_vm0, %v1612_v20, %v850_v24  ;;  %v996_v24 = vadd.s32 4294967208, %v954_v11  ;;  %vm1002_vm0 = vcmask 851712  }
 0x1b9   :  { %v1197_v13 = vpop.eup %1196  ;;  %v886_v54 = vmul.f32 %v1521_v47, %v866_v48 }
 0x1ba   :  { %v1199_v12 = vpop.eup %1198  ;;  %v828_v55 = vadd.f32 1.0, %v1197_v13  ;;  %v831_v53 = vmul.f32 -0.5, %v1197_v13  ;;  %v834_v3 = vand.u32 2147483647, %v1197_v13 }
 0x1bb   :  { %v928_v56 = vsel %vm507_vm5, %v886_v54, 0.0  ;;  %v821_v25 = vmul.f32 0.6931472, %v1199_v12 }
 0x1bc   :  { %929 = vadd.xlane.f32.xlu1 %v928_v56  ;;  %1200 = vlog2.f32 %v828_v55  ;;  %v832_v20 = vadd.f32 1.0, %v831_v53  ;;  %vm835_vm3 = vcmp.lt.f32.partialorder %v834_v3, 0.0004427343  ;;  %v1004_v55 = vadd.s32 4294967192, %v954_v11 }
 0x1bd   :  { %v827_v58 = vsel %vm826_vm1, %v824_v57, %v821_v25  ;;  %v1008_v53 = vadd.s32 4294967184, %v954_v11  ;;  %vm1006_vm1 = vcmask 917312  }
 0x1be   :  { %v851_v0 = vadd.f32 %v827_v58, %v595_v37  ;;  %v833_v42 = vmul.f32 %v1197_v13, %v832_v20 }
 0x1c0   :  { %v867_v26 = vsel %vm611_vm2, %v1622_v49, %v851_v0  ;;  %vm1010_vm2 = vcmask 982912  }
 0x1c1   :  { %v887_v15 = vmul.f32 %v1521_v47, %v867_v26  ;;  %v891_v29 = vpop.xlane.xlu0 %890 }
 0x1c2   :  { %v1201_v17 = vpop.eup %1200  ;;  %v955_v59 = vperm.slane %v891_v29, %v954_v11 }
 0x1c3   :  { %v931_v60 = vsel %vm507_vm5, %v887_v15, 0.0  ;;  %v830_v61 = vmul.f32 0.6931472, %v1201_v17  ;;  %v1012_v17 = vadd.s32 4294967176, %v954_v11 }
 0x1c4   :  { %932 = vadd.xlane.f32.xlu2 %v931_v60 }
 0x1c5   :  { %v836_v21 = vsel %vm835_vm3, %v833_v42, %v830_v61  ;;  %vm1014_vm3 = vcmask 1048512  }
 0x1c6   :  { %v852_v33 = vadd.f32 %v836_v21, %v596_v63 }
 0x1c8   :  { %v868_v4 = vsel %vm612_vm4, %v1632_v18, %v852_v33  ;;  %v968_v18 = vadd.s32 4294967264, %v954_v11 }
 0x1c9   :  { %v888_v49 = vmul.f32 %v1521_v47, %v868_v4  ;;  %v894_v6 = vpop.xlane.xlu0 %893 }
 0x1ca   :  { %v957_v47 = vperm.slane %v894_v6, %v956_v16 }
 0x1cb   :  { %v934_v51 = vsel %vm507_vm5, %v888_v49, 0.0  ;;  %vm958_vm5 = vcmask 130112  }
 0x1cc   :  { %935 = vadd.xlane.f32.xlu0 %v934_v51  ;;  %v959_v32 = vsel %vm958_vm5, %v957_v47, %v955_v59 }
 0x1d1   :  { %v897_v52 = vpop.xlane.xlu1 %896 }
 0x1d2   :  { %v961_v27 = vperm.slane %v897_v52, %v960_v19 }
 0x1d4   :  { %v963_v38 = vsel %vm962_vm6, %v961_v27, %v959_v32 }
 0x1d9   :  { %v900_v7 = vpop.xlane.xlu1 %899 }
 0x1da   :  { %v965_v39 = vperm.slane %v900_v7, %v964_v22 }
 0x1dc   :  { %v967_v45 = vsel %vm966_vm7, %v965_v39, %v963_v38 }
 0x1e3   :  { %v903_v1 = vpop.xlane.xlu2 %902 }
 0x1e4   :  { %v969_v9 = vperm.slane %v903_v1, %v968_v18 }
 0x1e6   :  { %v971_v43 = vsel %vm970_vm8, %v969_v9, %v967_v45 }
 0x1eb   :  { %v906_v8 = vpop.xlane.xlu2 %905 }
 0x1ec   :  { %v973_v34 = vperm.slane %v906_v8, %v972_v2 }
 0x1ee   :  { %v975_v54 = vsel %vm974_vm9, %v973_v34, %v971_v43 }
 0x1f1   :  { %v909_v5 = vpop.xlane.xlu0 %908 }
 0x1f2   :  { %v977_v41 = vperm.slane %v909_v5, %v976_v28 }
 0x1f4   :  { %v979_v56 = vsel %vm978_vm10, %v977_v41, %v975_v54 }
 0x1f9   :  { %v912_v10 = vpop.xlane.xlu1 %911 }
 0x1fa   :  { %v981_v46 = vperm.slane %v912_v10, %v980_v40 }
 0x1fc   :  { %v983_v37 = vsel %vm982_vm11, %v981_v46, %v979_v56 }
 0x207   :  { %v915_v14 = vpop.xlane.xlu2 %914 }
 0x208   :  { %v985_v48 = vperm.slane %v915_v14, %v984_v31 }
 0x20a   :  { %v987_v20 = vsel %vm986_vm12, %v985_v48, %v983_v37 }
 0x20f   :  { %v918_v23 = vpop.xlane.xlu0 %917 }
 0x210   :  { %v989_v12 = vperm.slane %v918_v23, %v988_v36 }
 0x212   :  { %v991_v3 = vsel %vm990_vm13, %v989_v12, %v987_v20 }
 0x217   :  { %v921_v62 = vpop.xlane.xlu1 %920 }
 0x218   :  { %v993_v25 = vperm.slane %v921_v62, %v992_v44 }
 0x21a   :  { %v995_v60 = vsel %vm994_vm14, %v993_v25, %v991_v3 }
 0x21f   :  { %v924_v30 = vpop.xlane.xlu2 %923 }
 0x220   :  { %v997_v58 = vperm.slane %v924_v30, %v996_v24 }
 0x222   :  { %v999_v42 = vsel %vm998_vm15, %v997_v58, %v995_v60 }
 0x227   :  { %v927_v13 = vpop.xlane.xlu0 %926 }
 0x228   :  { %v1001_v26 = vperm.slane %v927_v13, %v1000_v50 }
 0x22a   :  { %v1003_v63 = vsel %vm1002_vm0, %v1001_v26, %v999_v42 }
 0x22f   :  { %v930_v57 = vpop.xlane.xlu1 %929 }
 0x230   :  { %v1005_v15 = vperm.slane %v930_v57, %v1004_v55 }
 0x232   :  { %v1007_v33 = vsel %vm1006_vm1, %v1005_v15, %v1003_v63 }
 0x237   :  { %v933_v0 = vpop.xlane.xlu2 %932 }
 0x238   :  { %v1009_v61 = vperm.slane %v933_v0, %v1008_v53 }
 0x23a   :  { %v1011_v49 = vsel %vm1010_vm2, %v1009_v61, %v1007_v33 }
 0x23f   :  { %v936_v21 = vpop.xlane.xlu0 %935 }
 0x240   :  { %v1013_v4 = vperm.slane %v936_v21, %v1012_v17 }
 0x242   :  { %v1015_v51 = vsel %vm1014_vm3, %v1013_v4, %v1011_v49 }
 0x243   :  { %1017 = vst [vmem:[%s1668_s5] sm:$0x1] %v1015_v51 }

</bundles_post_ra>
